<compile_context>
chip_gen: v7x
topology: tpu7x:2x2x1
jax: 0.10.0
libtpu: 0.0.40
codegen_flags: <defaults>
</compile_context>

<pallas_src>
import functools

import jax
import jax.numpy as jnp
from jax.experimental import pallas as pl
from jax.experimental.pallas import tpu as pltpu

EPS = 1e-6
LANES = 128
SUB_ALIGN = 32   # lcm of f32(8)/bf16(16) logits and int8(32) label sublane tiles


def _cdiv(a, b):
    return -(-a // b)


def _default_tile_bytes():
    """~2 MiB tiles for v5e/v6e (already near HBM roofline); ~6 MiB on v7x so
    the fixed ~0.35us per-grid-step overhead is amortized vs 3.2 TB/s HBM."""
    try:
        kind = jax.devices()[0].device_kind.lower()
    except Exception:
        kind = ""
    if "v7" in kind or "tpu7" in kind:
        return 6 * 1024 * 1024
    return 2 * 1024 * 1024


def _dice_sel_kernel(x_ref, t_ref, out_ref, acc_ref, *, num_classes):
    # x_ref  : (1, C, TS, 128)  logits tile (input dtype; upcast after load)
    # t_ref  : (1, TS, 128)     int8/int32 labels, -1 on spatial padding
    # out_ref: (1, 1, 1)        f32 partial SEL sum, written at the last tile
    # acc_ref: (8, 128)         f32 running accumulator (one vreg)
    k = pl.program_id(2)
    nk = pl.num_programs(2)

    @pl.when(k == 0)
    def _():
        acc_ref[...] = jnp.zeros_like(acc_ref)

    t = t_ref[0].astype(jnp.int32)            # (TS, 128)

    # Class pass 1: running max + select x at the target class (fused one-hot).
    # Padding pixels (t == -1) keep x_sel = -inf  ->  exp(-inf) = 0 below.
    # TODO(synk): for num_classes >= ~32 switch these unrolled loops to a
    # bounded-unroll lax.fori_loop over dynamic x_ref[0, c].
    x0 = x_ref[0, 0].astype(jnp.float32)
    m = x0
    x_sel = jnp.where(t == 0, x0, -jnp.inf)
    for c in range(1, num_classes):
        xc = x_ref[0, c].astype(jnp.float32)
        m = jnp.maximum(m, xc)
        x_sel = jnp.where(t == c, xc, x_sel)

    # Class pass 2: softmax denominator (sub + exp + add per class).
    s = jnp.exp(x_ref[0, 0].astype(jnp.float32) - m)
    for c in range(1, num_classes):
        s = s + jnp.exp(x_ref[0, c].astype(jnp.float32) - m)

    # One reciprocal per pixel on the EUP, plus one Newton step (~1e-9 error).
    inv = pl.reciprocal(s, approx=True)
    inv = inv * (2.0 - s * inv)

    sel = jnp.exp(x_sel - m) * inv            # softmax[target]; 0 on padding

    # Fold the (TS,128) partial into the single-vreg accumulator; the reshape
    # splits sublanes into groups of 8, so it respects the (8,128) tiling.
    ts = sel.shape[0]
    acc_ref[...] += sel.reshape(ts // 8, 8, LANES).sum(axis=0)

    @pl.when(k == nk - 1)
    def _():
        out_ref[0] = jnp.sum(acc_ref[...], axis=(0, 1), keepdims=True)


def dice_loss(inp, target, *, target_tile_bytes=None):
    """inp: (N, C, H, W) float logits; target: (N, H, W) integer labels."""
    if inp.ndim != 4:
        raise ValueError(f"Invalid inp shape, expected NxCxHxW, got {inp.shape}")
    if inp.shape[-2:] != target.shape[-2:]:
        raise ValueError("inp and target spatial shapes must match")

    N, C, H, W = inp.shape
    HW = H * W

    if target_tile_bytes is None:
        target_tile_bytes = _default_tile_bytes()

    # Keep narrow float dtypes (bf16/f16) in HBM; the kernel upcasts after load.
    if not jnp.issubdtype(inp.dtype, jnp.floating):
        inp = inp.astype(jnp.float32)
    itemsize = jnp.dtype(inp.dtype).itemsize

    # Labels streamed as int8 when the class ids (and -1 pad sentinel) fit.
    label_dtype = jnp.int8 if C <= 127 else jnp.int32
    label_itemsize = jnp.dtype(label_dtype).itemsize

    # ---- spatial tiling: tiles of (ts_sub, 128), ts_sub a 32-sublane multiple ----
    n_sub = _cdiv(HW, LANES)
    n_sub_aligned = _cdiv(n_sub, SUB_ALIGN) * SUB_ALIGN
    ts_sub = max(SUB_ALIGN,
                 (target_tile_bytes // (C * LANES * itemsize))
                 // SUB_ALIGN * SUB_ALIGN)
    ts_sub = min(ts_sub, n_sub_aligned)
    n_k_total = _cdiv(n_sub_aligned, ts_sub)

    # For single-image calls, split the spatial axis over a second "parallel"
    # grid axis so both TensorCores are used on v7x (harmless on 1-TC chips).
    P = 2 if (N == 1 and n_k_total >= 2) else 1
    n_k_total = _cdiv(n_k_total, P) * P
    n_k = n_k_total // P
    sub_pad = n_k_total * ts_sub
    hw_pad = sub_pad * LANES

    x = inp.reshape(N, C, HW)
    t = target.astype(label_dtype).reshape(N, HW)
    pad = hw_pad - HW
    if pad:
        x = jnp.pad(x, ((0, 0), (0, 0), (0, pad)))
        t = jnp.pad(t, ((0, 0), (0, pad)), constant_values=-1)   # pad sentinel
    x = x.reshape(N, C, sub_pad, LANES)
    t = t.reshape(N, sub_pad, LANES)

    kernel = functools.partial(_dice_sel_kernel, num_classes=C)

    # VMEM budget: double-buffered input tiles + f32 intermediates + slack,
    # clamped to fit v5e/v6e defaults and v7x's 64 MiB physical VMEM.
    x_tile_bytes = C * ts_sub * LANES * itemsize
    t_tile_bytes = ts_sub * LANES * label_itemsize
    f32_tile_bytes = ts_sub * LANES * 4
    vmem_limit = int(min(max(4 * (x_tile_bytes + t_tile_bytes)
                             + 6 * f32_tile_bytes + (1 << 16),
                             16 * 1024 * 1024),
                         48 * 1024 * 1024))

    partial_sel = pl.pallas_call(
        kernel,
        out_shape=jax.ShapeDtypeStruct((N, P, 1), jnp.float32),
        grid_spec=pltpu.PrefetchScalarGridSpec(
            num_scalar_prefetch=0,
            grid=(N, P, n_k),
            in_specs=[
                pl.BlockSpec((1, C, ts_sub, LANES),
                             lambda b, p, k: (b, 0, p * n_k + k, 0)),
                pl.BlockSpec((1, ts_sub, LANES),
                             lambda b, p, k: (b, p * n_k + k, 0)),
            ],
            out_specs=pl.BlockSpec((1, 1, 1), lambda b, p, k: (b, p, 0)),
            scratch_shapes=[pltpu.VMEM((8, LANES), jnp.float32)],
        ),
        compiler_params=pltpu.CompilerParams(
            dimension_semantics=("parallel", "parallel", "arbitrary"),
            vmem_limit_bytes=vmem_limit,
        ),
    )(x, t)

    # Closed-form Dice given SEL (since sum_c softmax == 1 per valid pixel):
    #   inter = SEL + eps*HW ; card = 2*HW + eps*C*HW
    sel_total = jnp.sum(partial_sel, axis=(1, 2))            # (N,)
    npix = float(HW)
    inter = sel_total + EPS * npix
    card = 2.0 * npix + EPS * C * npix
    dice = 2.0 * inter / (card + EPS)
    return jnp.mean(1.0 - dice)


def _dice_loss_ref(inp, target):
    # pure-JAX reference mirroring the PyTorch module
    soft = jax.nn.softmax(inp.astype(jnp.float32), axis=1)
    C = inp.shape[1]
    one_hot = jax.nn.one_hot(target, C, axis=1, dtype=jnp.float32) + EPS
    inter = jnp.sum(soft * one_hot, axis=(1, 2, 3))
    card = jnp.sum(soft + one_hot, axis=(1, 2, 3))
    dice = 2.0 * inter / (card + EPS)
    return jnp.mean(1.0 - dice)


if __name__ == "__main__":
    key = jax.random.PRNGKey(0)
    keys = jax.random.split(key, 8)

    def _check(inp, target, **kw):
        loss = jax.block_until_ready(dice_loss(inp, target, **kw))
        ref = jax.block_until_ready(_dice_loss_ref(inp, target))
        assert jnp.allclose(loss, ref, atol=1e-5, rtol=1e-5), (loss, ref)

    # 1) primary shape from the module spec
    N, C, H, W = 2, 4, 16, 16
    inp = jax.random.normal(keys[0], (N, C, H, W), dtype=jnp.float32)
    tgt = jax.random.randint(keys[1], (N, H, W), 0, C, dtype=jnp.int32)
    _check(inp, tgt)

    # 2) odd spatial shape -> spatial padding / -1 sentinel masking path
    inp2 = jax.random.normal(keys[2], (3, 5, 7, 9), dtype=jnp.float32)
    tgt2 = jax.random.randint(keys[3], (3, 7, 9), 0, 5, dtype=jnp.int32)
    _check(inp2, tgt2)

    # 3) multi-tile streaming accumulation (n_k > 1) via a small forced tile
    inp3 = jax.random.normal(keys[4], (2, 4, 68, 68), dtype=jnp.float32)
    tgt3 = jax.random.randint(keys[5], (2, 68, 68), 0, 4, dtype=jnp.int32)
    _check(inp3, tgt3, target_tile_bytes=64 * 1024)

    # 4) N == 1 -> spatial split across the second "parallel" axis (P = 2)
    inp4 = jax.random.normal(keys[6], (1, 3, 72, 72), dtype=jnp.float32)
    tgt4 = jax.random.randint(keys[7], (1, 72, 72), 0, 3, dtype=jnp.int32)
    _check(inp4, tgt4, target_tile_bytes=64 * 1024)

    # 5) bf16 logits stay bf16 in HBM (kernel upcasts after the load)
    _check(inp.astype(jnp.bfloat16), tgt)

    print("KERNEL_OK")
</pallas_src>

<mosaic_0001>
module attributes {stable_mosaic.version = 11 : i64} {
  func.func @_dice_sel_kernel(%arg0: i32, %arg1: i32, %arg2: i32, %arg3: memref<1x4x32x128xf32, #tpu.memory_space<vmem>>, %arg4: memref<1x32x128xi8, #tpu.memory_space<vmem>>, %arg5: memref<1x1x1xf32, #tpu.memory_space<vmem>>, %arg6: memref<8x128xf32, #tpu.memory_space<vmem>>) attributes {dimension_semantics = [#tpu.dimension_semantics<parallel>, #tpu.dimension_semantics<parallel>, #tpu.dimension_semantics<arbitrary>], iteration_bounds = array<i64: 2, 1, 1>, scalar_prefetch = 0 : i64, scratch_operands = 1 : i64, tpu.core_type = #tpu.core_type<tc>, window_params = [{transform_indices = @transform_0, window_bounds = array<i64: 1, 4, 32, 128>}, {transform_indices = @transform_1, window_bounds = array<i64: 1, 32, 128>}, {transform_indices = @transform_2, window_bounds = array<i64: 1, 1, 1>}]} {
    %c0_i32 = arith.constant 0 : i32
    %0 = arith.cmpi eq, %arg2, %c0_i32 : i32
    %1 = arith.extui %0 : i1 to i32
    %c0_i32_0 = arith.constant 0 : i32
    %2 = arith.cmpi ne, %1, %c0_i32_0 : i32
    scf.if %2 {
      %cst_41 = arith.constant 0.000000e+00 : f32
      %65 = vector.broadcast %cst_41 : f32 to vector<8x128xf32>
      %c0_42 = arith.constant 0 : index
      %c0_43 = arith.constant 0 : index
      %66 = vector.load %arg6[%c0_42, %c0_43] : memref<8x128xf32, #tpu.memory_space<vmem>>, vector<8x128xf32>
      tpu.vector_store %arg6[%c0_42, %c0_43], %65 {strides = array<i32>} : memref<8x128xf32, #tpu.memory_space<vmem>>, vector<8x128xf32>,
    } else {
    }
    %c0 = arith.constant 0 : index
    %c0_1 = arith.constant 0 : index
    %c0_2 = arith.constant 0 : index
    %3 = vector.load %arg4[%c0, %c0_1, %c0_2] : memref<1x32x128xi8, #tpu.memory_space<vmem>>, vector<1x32x128xi8>
    %4 = vector.shape_cast %3 : vector<1x32x128xi8> to vector<32x128xi8>
    %5 = arith.extsi %4 : vector<32x128xi8> to vector<32x128xi32>
    %c0_3 = arith.constant 0 : index
    %c0_4 = arith.constant 0 : index
    %c0_5 = arith.constant 0 : index
    %c0_6 = arith.constant 0 : index
    %6 = vector.load %arg3[%c0_3, %c0_4, %c0_5, %c0_6] : memref<1x4x32x128xf32, #tpu.memory_space<vmem>>, vector<1x1x32x128xf32>
    %7 = vector.shape_cast %6 : vector<1x1x32x128xf32> to vector<32x128xf32>
    %c0_i32_7 = arith.constant 0 : i32
    %8 = vector.broadcast %c0_i32_7 : i32 to vector<32x128xi32>
    %9 = arith.cmpi eq, %5, %8 : vector<32x128xi32>
    %cst = arith.constant 0xFF800000 : f32
    %10 = vector.broadcast %cst : f32 to vector<32x128xf32>
    %11 = arith.select %9, %7, %10 : vector<32x128xi1>, vector<32x128xf32>
    %c0_8 = arith.constant 0 : index
    %c1 = arith.constant 1 : index
    %c0_9 = arith.constant 0 : index
    %c0_10 = arith.constant 0 : index
    %12 = vector.load %arg3[%c0_8, %c1, %c0_9, %c0_10] : memref<1x4x32x128xf32, #tpu.memory_space<vmem>>, vector<1x1x32x128xf32>
    %13 = vector.shape_cast %12 : vector<1x1x32x128xf32> to vector<32x128xf32>
    %14 = arith.maximumf %7, %13 : vector<32x128xf32>
    %c1_i32 = arith.constant 1 : i32
    %15 = vector.broadcast %c1_i32 : i32 to vector<32x128xi32>
    %16 = arith.cmpi eq, %5, %15 : vector<32x128xi32>
    %17 = arith.select %16, %13, %11 : vector<32x128xi1>, vector<32x128xf32>
    %c0_11 = arith.constant 0 : index
    %c2 = arith.constant 2 : index
    %c0_12 = arith.constant 0 : index
    %c0_13 = arith.constant 0 : index
    %18 = vector.load %arg3[%c0_11, %c2, %c0_12, %c0_13] : memref<1x4x32x128xf32, #tpu.memory_space<vmem>>, vector<1x1x32x128xf32>
    %19 = vector.shape_cast %18 : vector<1x1x32x128xf32> to vector<32x128xf32>
    %20 = arith.maximumf %14, %19 : vector<32x128xf32>
    %c2_i32 = arith.constant 2 : i32
    %21 = vector.broadcast %c2_i32 : i32 to vector<32x128xi32>
    %22 = arith.cmpi eq, %5, %21 : vector<32x128xi32>
    %23 = arith.select %22, %19, %17 : vector<32x128xi1>, vector<32x128xf32>
    %c0_14 = arith.constant 0 : index
    %c3 = arith.constant 3 : index
    %c0_15 = arith.constant 0 : index
    %c0_16 = arith.constant 0 : index
    %24 = vector.load %arg3[%c0_14, %c3, %c0_15, %c0_16] : memref<1x4x32x128xf32, #tpu.memory_space<vmem>>, vector<1x1x32x128xf32>
    %25 = vector.shape_cast %24 : vector<1x1x32x128xf32> to vector<32x128xf32>
    %26 = arith.maximumf %20, %25 : vector<32x128xf32>
    %c3_i32 = arith.constant 3 : i32
    %27 = vector.broadcast %c3_i32 : i32 to vector<32x128xi32>
    %28 = arith.cmpi eq, %5, %27 : vector<32x128xi32>
    %29 = arith.select %28, %25, %23 : vector<32x128xi1>, vector<32x128xf32>
    %c0_17 = arith.constant 0 : index
    %c0_18 = arith.constant 0 : index
    %c0_19 = arith.constant 0 : index
    %c0_20 = arith.constant 0 : index
    %30 = vector.load %arg3[%c0_17, %c0_18, %c0_19, %c0_20] : memref<1x4x32x128xf32, #tpu.memory_space<vmem>>, vector<1x1x32x128xf32>
    %31 = vector.shape_cast %30 : vector<1x1x32x128xf32> to vector<32x128xf32>
    %32 = arith.subf %31, %26 : vector<32x128xf32>
    %33 = math.exp %32 : vector<32x128xf32>
    %c0_21 = arith.constant 0 : index
    %c1_22 = arith.constant 1 : index
    %c0_23 = arith.constant 0 : index
    %c0_24 = arith.constant 0 : index
    %34 = vector.load %arg3[%c0_21, %c1_22, %c0_23, %c0_24] : memref<1x4x32x128xf32, #tpu.memory_space<vmem>>, vector<1x1x32x128xf32>
    %35 = vector.shape_cast %34 : vector<1x1x32x128xf32> to vector<32x128xf32>
    %36 = arith.subf %35, %26 : vector<32x128xf32>
    %37 = math.exp %36 : vector<32x128xf32>
    %38 = arith.addf %33, %37 : vector<32x128xf32>
    %c0_25 = arith.constant 0 : index
    %c2_26 = arith.constant 2 : index
    %c0_27 = arith.constant 0 : index
    %c0_28 = arith.constant 0 : index
    %39 = vector.load %arg3[%c0_25, %c2_26, %c0_27, %c0_28] : memref<1x4x32x128xf32, #tpu.memory_space<vmem>>, vector<1x1x32x128xf32>
    %40 = vector.shape_cast %39 : vector<1x1x32x128xf32> to vector<32x128xf32>
    %41 = arith.subf %40, %26 : vector<32x128xf32>
    %42 = math.exp %41 : vector<32x128xf32>
    %43 = arith.addf %38, %42 : vector<32x128xf32>
    %c0_29 = arith.constant 0 : index
    %c3_30 = arith.constant 3 : index
    %c0_31 = arith.constant 0 : index
    %c0_32 = arith.constant 0 : index
    %44 = vector.load %arg3[%c0_29, %c3_30, %c0_31, %c0_32] : memref<1x4x32x128xf32, #tpu.memory_space<vmem>>, vector<1x1x32x128xf32>
    %45 = vector.shape_cast %44 : vector<1x1x32x128xf32> to vector<32x128xf32>
    %46 = arith.subf %45, %26 : vector<32x128xf32>
    %47 = math.exp %46 : vector<32x128xf32>
    %48 = arith.addf %43, %47 : vector<32x128xf32>
    %49 = tpu.reciprocal %48 {approx = true} : vector<32x128xf32> -> vector<32x128xf32>
    %50 = arith.mulf %48, %49 : vector<32x128xf32>
    %cst_33 = arith.constant 2.000000e+00 : f32
    %51 = vector.broadcast %cst_33 : f32 to vector<32x128xf32>
    %52 = arith.subf %51, %50 : vector<32x128xf32>
    %53 = arith.mulf %49, %52 : vector<32x128xf32>
    %54 = arith.subf %29, %26 : vector<32x128xf32>
    %55 = math.exp %54 : vector<32x128xf32>
    %56 = arith.mulf %55, %53 : vector<32x128xf32>
    %c0_34 = arith.constant 0 : index
    %c0_35 = arith.constant 0 : index
    %57 = vector.load %arg6[%c0_34, %c0_35] : memref<8x128xf32, #tpu.memory_space<vmem>>, vector<8x128xf32>
    %58 = vector.shape_cast %56 : vector<32x128xf32> to vector<4x8x128xf32>
    %cst_36 = arith.constant dense<0.000000e+00> : vector<8x128xf32>
    %59 = vector.multi_reduction <add>, %58, %cst_36 [0] : vector<4x8x128xf32> to vector<8x128xf32>
    %60 = arith.addf %57, %59 : vector<8x128xf32>
    %c0_37 = arith.constant 0 : index
    %c0_38 = arith.constant 0 : index
    %61 = vector.load %arg6[%c0_37, %c0_38] : memref<8x128xf32, #tpu.memory_space<vmem>>, vector<8x128xf32>
    tpu.vector_store %arg6[%c0_37, %c0_38], %60 {strides = array<i32>} : memref<8x128xf32, #tpu.memory_space<vmem>>, vector<8x128xf32>,
    %c0_i32_39 = arith.constant 0 : i32
    %62 = arith.cmpi eq, %arg2, %c0_i32_39 : i32
    %63 = arith.extui %62 : i1 to i32
    %c0_i32_40 = arith.constant 0 : i32
    %64 = arith.cmpi ne, %63, %c0_i32_40 : i32
    scf.if %64 {
      %c0_41 = arith.constant 0 : index
      %c0_42 = arith.constant 0 : index
      %65 = vector.load %arg6[%c0_41, %c0_42] : memref<8x128xf32, #tpu.memory_space<vmem>>, vector<8x128xf32>
      %66 = vector.shape_cast %65 : vector<8x128xf32> to vector<1x8x128xf32>
      %cst_43 = arith.constant dense<0.000000e+00> : vector<1xf32>
      %67 = vector.multi_reduction <add>, %66, %cst_43 [1, 2] : vector<1x8x128xf32> to vector<1xf32>
      %68 = vector.shape_cast %67 : vector<1xf32> to vector<1x1x1xf32>
      %69 = vector.extract %68[0, 0, 0] : f32 from vector<1x1x1xf32>
      %70 = vector.broadcast %69 : f32 to vector<1x1xf32>
      %c0_44 = arith.constant 0 : index
      %c0_45 = arith.constant 0 : index
      %c0_46 = arith.constant 0 : index
      %71 = vector.load %arg5[%c0_44, %c0_45, %c0_46] : memref<1x1x1xf32, #tpu.memory_space<vmem>>, vector<1x1x1xf32>
      %72 = vector.shape_cast %71 : vector<1x1x1xf32> to vector<1x1xf32>
      %73 = vector.shape_cast %70 : vector<1x1xf32> to vector<1x1x1xf32>
      tpu.vector_store %arg5[%c0_44, %c0_45, %c0_46], %73 {strides = array<i32>} : memref<1x1x1xf32, #tpu.memory_space<vmem>>, vector<1x1x1xf32>,
    } else {
    }
    return
  }
  func.func @transform_0(%arg0: i32, %arg1: i32, %arg2: i32) -> (i32, i32, i32, i32) {
    %c1_i32 = arith.constant 1 : i32
    %0 = arith.muli %arg1, %c1_i32 : i32
    %1 = arith.addi %0, %arg2 : i32
    %c0_i32 = arith.constant 0 : i32
    %c0_i32_0 = arith.constant 0 : i32
    %c0_i32_1 = arith.constant 0 : i32
    return %arg0, %c0_i32, %1, %c0_i32_0 : i32, i32, i32, i32
  }
  func.func @transform_1(%arg0: i32, %arg1: i32, %arg2: i32) -> (i32, i32, i32) {
    %c1_i32 = arith.constant 1 : i32
    %0 = arith.muli %arg1, %c1_i32 : i32
    %1 = arith.addi %0, %arg2 : i32
    %c0_i32 = arith.constant 0 : i32
    %c0_i32_0 = arith.constant 0 : i32
    return %arg0, %1, %c0_i32 : i32, i32, i32
  }
  func.func @transform_2(%arg0: i32, %arg1: i32, %arg2: i32) -> (i32, i32, i32) {
    %c0_i32 = arith.constant 0 : i32
    %c0_i32_0 = arith.constant 0 : i32
    return %arg0, %arg1, %c0_i32 : i32, i32, i32
  }
}

</mosaic_0001>

<bundles_post_ra>
// kernel: tpu_custom_call.1
= control target key start
LH: loop header
LB: loop body
LE: loop exit
PB: predicated region body
PF: predicated region fallthrough
CT: control target
= control target key end

     0   :  { %7 = vsyncpa [#allocation4], 0  ;;  %s1133_s0 = inlined_call_operand.hbm [shape: f32[2,4,32,128], index: 0, kind: input, shape index: {}]   ;;  %s1134_s1 = inlined_call_operand.hbm [shape: s8[2,32,128], index: 1, kind: input, shape index: {}]   ;;  %s1135_s2 = inlined_call_operand.vmem [shape: f32[2,1,1], index: 2, kind: output, shape index: {}]  }
   0x1   :  { %9 = vsyncpa [#allocation4 + $0x1], 0 }
   0x2   :  { %10 = vsyncpa [#allocation6], 0 }
   0x3   :  { %12 = vsyncpa [#allocation6 + $0x1], 0  ;;  %s810_s9 = smov 0   ;;  %s812_s10 = smov 0  }
   0x4   :  { %s814_s11 = smov 0   ;;  %s816_s12 = smov 0  }
   0x5   :  { %s818_s13 = smov 0   ;;  %s820_s14 = smov 0  }
   0x6 LB: > { %s536_s15 = sadd.s32 4294967295, %s789_s14   ;;  %s37_s16 = sadd.s32 1, %s785_s13  ;;  %s789_s14 = sphi %s820_s14, %s18_s14   ;;  %s785_s13 = sphi %s818_s13, %s1147_s13   ;;  %s781_s12 = sphi %s816_s12, %s1146_s12   ;;  %s777_s11 = sphi %s814_s11, %s1145_s11   ;;  %s773_s10 = sphi %s812_s10, %s1144_s10   ;;  %s769_s9 = sphi %s810_s9, %s1143_s9  }
   0x7   : > { %p39_p0 = scmp.ge.s32.totalorder %s37_s16, 2  ;;  %s48_s17 = sadd.s32 1, %s777_s11 }
   0x8   : > { %p55_p1 = scmp.ne.s32.totalorder %s777_s11, %s773_s10  ;;  %p56_p2 = scmp.eq.s32.totalorder %s789_s14, 0 }
   0x9   : > { %s1149_s16 = smov (%p39_p0, %s37_s16), 0  ;;  %p61_p4 = scmp.ne.s32.totalorder %s773_s10, %s769_s9 }
   0xa   : > { %p846_p3 = por %p56_p2, %p55_p1  ;;  %s43_s19 = ssub.s32 %s785_s13, %s1149_s16 }
   0xb   : > { %p62_p5 = scmp.eq.s32.totalorder %s536_s15, 0  ;;  %p46_p6 = scmp.eq.s32.totalorder %s43_s19, 0 }
   0xc   : > { %p576_p8 = scmp.lt.s32.totalorder %s789_s14, 2  ;;  %s862_s22 = sand.u32 1, %s777_s11  }
   0xd   : > { %p853_p7 = por %p62_p5, %p61_p4  ;;  %s562_s23 = sshll.u32 %s785_s13, 11 }
   0xe   : > { %s859_s21 = scalar_select %p46_p6, %s777_s11, %s48_s17  }
   0xf   : > { %s1138_s20 = scalar_select %p853_p7, 1, 0 }
  0x10   : > { %s540_s24 = sshll.u32 %s862_s22, 7  ;;  %s869_s27 = scalar_lea.hbm %s1133_s0, %s562_s23 }
  0x11   : > { %s147_s28 = scalar_lea.vmem [#allocation3], %s540_s24  ;;  %p873_p9 = pnand %p576_p8, %p846_p3 }
  0x12   : > { %s157_s29 = sshll.u32 %s147_s28, 4  ;;  %s144_s3 = scalar_lea.sflag [#allocation4], %s862_s22  ;;  %s877_s29 = int_to_ptr.vmem [resolvable:$true] %s157_s29 }
  0x13   : > { %s675_s4 = scalar_lea.hbm %s869_s27, 2048  ;;  %p677_p11 = pneg %p873_p9 }
  0x14   : > { %p676_p10 = scmp.ne.s32.totalorder %s869_s27, %s675_s4  ;;  %s680_s7 = scalar_lea.hbm %s1133_s0, 4096 }
  0x15   : > { %p681_p0 = scmp.lt.u32.totalorder %s869_s27, %s1133_s0  ;;  %p682_p1 = scmp.lt.u32.totalorder %s680_s7, %s675_s4 }
  0x16   : > { %p678_p12 = pnand %p677_p11, %p676_p10  ;;  %p684_p3 = scmp.lt.u32.totalorder %s675_s4, %s869_s27 }
  0x17   : > { %p683_p2 = por %p682_p1, %p681_p0 }
  0x18   : > { %p679_p13 = pneg %p678_p12 }
  0x19   : > { %p685_p4 = por %p684_p3, %p683_p2 }
  0x1b   : > { %p686_p5 = pnand %p685_p4, %p679_p13 }
  0x1d   : > { %689 = shalt.err (!%p686_p5)
}
  0x1e   : > { %s690_s15 = scalar_lea.vmem %s877_s29, 2048  ;;  %s791_s17 = smov [#allocation3]  }
  0x1f   : > { %p691_p6 = scmp.ne.s32.totalorder %s877_s29, %s690_s15  ;;  %s695_s18 = sshll.u32 %s791_s17, 4  ;;  %s696_s18 = int_to_ptr.vmem [resolvable:$false] %s695_s18 }
  0x20   : > { %s697_s19 = scalar_lea.vmem %s696_s18, 4096  ;;  %p698_p12 = scmp.lt.s32.totalorder %s877_s29, %s696_s18 }
  0x21   : > { %p693_p8 = pnand %p691_p6, %p677_p11  ;;  %p699_p0 = scmp.lt.s32.totalorder %s697_s19, %s690_s15 }
  0x23   : > { %p694_p10 = pneg %p693_p8  ;;  %p700_p1 = por %p699_p0, %p698_p12 }
  0x25   : > { %p701_p2 = pnand %p700_p1, %p694_p10 }
  0x27   : > { %704 = shalt.err (!%p701_p2)
}
  0x28   : > { %s792_s23 = smov 128   ;;  %s793_s24 = smov 8  }
  0x29   : > { %572 = dma.hbm_to_vmem [thread:$0]  (!%p873_p9), %s869_s27, 2048, %s877_s29, %s144_s3, %s792_s23, %s792_s23, %s793_s24  }
  0x2a   : > { %p545_p13 = scmp.ge.s32.totalorder %s789_s14, 1  ;;  %p185_p3 = scmp.lt.s32.totalorder %s789_s14, 3 }
  0x2b   : > { %s543_s25 = sshll.u32 %s862_s22, 3  ;;  %s544_s28 = sshll.u32 %s785_s13, 7 }
  0x2c   : > { %p910_p4 = pnand %p545_p13, %p185_p3  ;;  %s171_s4 = scalar_lea.vmem [#allocation5], %s543_s25 }
  0x2d   : > { %s180_s5 = sshll.u32 %s171_s4, 4  ;;  %s918_s8 = scalar_lea.hbm %s1134_s1, %s544_s28  ;;  %s181_s5 = int_to_ptr.vmem [resolvable:$true] %s180_s5 }
  0x2e   : > { %s1140_s26 = scalar_select %p910_p4, 1, 0 }
  0x2f   : > { %s168_s27 = scalar_lea.sflag [#allocation6], %s862_s22  ;;  %s705_s29 = scalar_lea.hbm %s918_s8, 128 }
  0x30   : > { %p706_p5 = scmp.ne.s32.totalorder %s918_s8, %s705_s29  ;;  %s710_s15 = scalar_lea.hbm %s1134_s1, 256 }
  0x31   : > { %p711_p10 = scmp.lt.u32.totalorder %s918_s8, %s1134_s1  ;;  %p712_p12 = scmp.lt.u32.totalorder %s710_s15, %s705_s29 }
  0x32   : > { %p708_p6 = pnand %p706_p5, %p677_p11  ;;  %p714_p1 = scmp.lt.u32.totalorder %s705_s29, %s918_s8 }
  0x33   : > { %p713_p0 = por %p712_p12, %p711_p10 }
  0x34   : > { %p709_p8 = pneg %p708_p6 }
  0x35   : > { %p715_p2 = por %p714_p1, %p713_p0 }
  0x37   : > { %p716_p13 = pnand %p715_p2, %p709_p8 }
  0x39   : > { %719 = shalt.err (!%p716_p13)
}
  0x3a   : > { %s720_s22 = scalar_lea.vmem %s181_s5, 128  ;;  %s794_s19 = smov [#allocation5]  }
  0x3b   : > { %p721_p3 = scmp.ne.s32.totalorder %s181_s5, %s720_s22  ;;  %s725_s23 = sshll.u32 %s794_s19, 4  ;;  %s726_s23 = int_to_ptr.vmem [resolvable:$false] %s725_s23 }
  0x3c   : > { %s727_s24 = scalar_lea.vmem %s726_s23, 256  ;;  %p728_p7 = scmp.lt.s32.totalorder %s181_s5, %s726_s23 }
  0x3d   : > { %p723_p5 = pnand %p721_p3, %p677_p11  ;;  %p729_p4 = scmp.lt.s32.totalorder %s727_s24, %s720_s22 }
  0x3f   : > { %p724_p6 = pneg %p723_p5  ;;  %p730_p10 = por %p729_p4, %p728_p7 }
  0x41   : > { %p731_p12 = pnand %p730_p10, %p724_p6 }
  0x43   : > { %734 = shalt.err (!%p731_p12)
}
  0x44   : > { %575 = dma.hbm_to_vmem [thread:$0]  (!%p873_p9), %s918_s8, 128, %s181_s5, %s168_s27  }
  0x45   : > { %p1141_p8 = scmp.ne.s32.totalorder %s1140_s26, 0 }
  0x46   : > { %s191_s25 = sand.u32 (!%p1141_p8), 1, %s773_s10   ;;  %p1142_p11 = scmp.ne.s32.totalorder (!%p1141_p8), %s1138_s20, 0 }
  0x47   : > { %189 = sbr.rel (%p1141_p8) target bundleno = 351 (0x15f), region = 28  ;;  %s546_s28 = sshll.u32 (!%p1141_p8), %s191_s25, 7 }
  0x48   : > { %s192_s4 = scalar_lea.sflag (!%p1141_p8), [#allocation4], %s191_s25  ;;  %s943_s6 = scalar_lea.vmem (!%p1141_p8), [#allocation3], %s546_s28 }
  0x4e   : > { %760 = dma.done.wait (%p1142_p11), %s192_s4, 2048  }
  0x4f   : > { %762 = vsyncadd (%p1142_p11), %s192_s4, 4294965248  ;;  %s547_s7 = sshll.u32 %s191_s25, 3  ;;  %s201_s30 = scalar_lea.sflag [#allocation6], %s191_s25 }
  0x50   : > { %s949_s29 = scalar_lea.vmem [#allocation5], %s547_s7 }
  0x51   : > { %764 = dma.done.wait (%p1142_p11), %s201_s30, 128  }
  0x52   : > { %766 = vsyncadd (%p1142_p11), %s201_s30, 4294967168  ;;  %v956_v0 = vld [vmem:[%s943_s6] sm:$0xff]  ;;  %v959_v1 = vld [vmem:[%s943_s6 + $0x8] sm:$0xff]  ;;  %p234_p7 = scmp.lt.s32.totalorder %s781_s12, 1 }
  0x53   : > { %v962_v2 = vld [vmem:[%s943_s6 + $0x10] sm:$0xff]  ;;  %v965_v3 = vld [vmem:[%s943_s6 + $0x18] sm:$0xff]  ;;  %v968_v4 = vld [vmem:[%s943_s6 + $0x20] sm:$0xff] }
  0x54   : > { %v971_v5 = vld [vmem:[%s943_s6 + $0x28] sm:$0xff]  ;;  %v974_v6 = vld [vmem:[%s943_s6 + $0x30] sm:$0xff]  ;;  %v977_v7 = vld [vmem:[%s943_s6 + $0x38] sm:$0xff]  ;;  %v267_v8 = vmax.f32 %v956_v0, %v968_v4  ;;  %s1151_s12 = smov (!%p234_p7, %s781_s12), 1 }
  0x55   : > { %v982_v9 = vld [vmem:[%s943_s6 + $0x40] sm:$0xff]  ;;  %v268_v10 = vmax.f32 %v959_v1, %v971_v5  ;;  %v269_v11 = vmax.f32 %v962_v2, %v974_v6  ;;  %v270_v12 = vmax.f32 %v965_v3, %v977_v7  ;;  %v991_v13 = vld [vmem:[%s943_s6 + $0x48] sm:$0xff]  ;;  %v994_v14 = vld [vmem:[%s943_s6 + $0x50] sm:$0xff]  ;;  %s239_s5 = scalar_lea.vmem %s1135_s2, %s1151_s12 }
  0x56   : > { %v997_v15 = vld [vmem:[%s943_s6 + $0x58] sm:$0xff]  ;;  %v284_v16 = vmax.f32 %v267_v8, %v982_v9  ;;  %v1001_v17 = vld [vmem:[%s943_s6 + $0x60] sm:$0xff]  ;;  %v1007_v21 = vld [vmem:[%s943_s6 + $0x68] sm:$0xff] }
  0x57   : > { %v285_v18 = vmax.f32 %v268_v10, %v991_v13  ;;  %v286_v19 = vmax.f32 %v269_v11, %v994_v14  ;;  %v287_v20 = vmax.f32 %v270_v12, %v997_v15  ;;  %v1010_v22 = vld [vmem:[%s943_s6 + $0x70] sm:$0xff]  ;;  %v1013_v23 = vld [vmem:[%s943_s6 + $0x78] sm:$0xff]  ;;  %v245_v29 = vld [vmem:[%s949_s29] sm:$0xff] }
  0x58   : > { %v1016_v24 = vmax.f32 %v284_v16, %v1001_v17  ;;  %v1044_v41 = vunpack.c.0.s8 %v245_v29  ;;  %v1048_v44 = vunpack.c.1.s8 %v245_v29  ;;  %v1052_v47 = vunpack.c.2.s8 %v245_v29 }
  0x59   : > { %v1019_v25 = vmax.f32 %v285_v18, %v1007_v21  ;;  %v1022_v26 = vmax.f32 %v286_v19, %v1010_v22  ;;  %v1025_v27 = vmax.f32 %v287_v20, %v1013_v23  ;;  %v1056_v50 = vunpack.c.3.s8 %v245_v29 }
  0x5a   : > { %v313_v28 = vsub.f32 %v956_v0, %v1016_v24  ;;  %v325_v33 = vsub.f32 %v968_v4, %v1016_v24  ;;  %v341_v43 = vsub.f32 %v982_v9, %v1016_v24  ;;  %vm254_vm0 = vcmp.eq.s32.totalorder %v1044_v41, 0 }
  0x5b   : > { %v314_v30 = vsub.f32 %v959_v1, %v1019_v25  ;;  %v315_v31 = vsub.f32 %v962_v2, %v1022_v26  ;;  %v316_v32 = vsub.f32 %v965_v3, %v1025_v27  ;;  %v326_v35 = vsub.f32 %v971_v5, %v1019_v25 }
  0x5c   : > { %v317_v34 = vmul.f32 1.442695, %v313_v28  ;;  %v327_v36 = vsub.f32 %v974_v6, %v1022_v26  ;;  %v328_v40 = vsub.f32 %v977_v7, %v1025_v27  ;;  %v329_v42 = vmul.f32 1.442695, %v325_v33 }
  0x5d   : > { %v319_v37 = vmul.f32 1.442695, %v314_v30  ;;  %v321_v38 = vmul.f32 1.442695, %v315_v31  ;;  %v323_v39 = vmul.f32 1.442695, %v316_v32  ;;  %v342_v46 = vsub.f32 %v991_v13, %v1019_v25 }
  0x5e   : > { %627 = vpow2.f32 %v317_v34  ;;  %v331_v45 = vmul.f32 1.442695, %v326_v35  ;;  %v333_v48 = vmul.f32 1.442695, %v327_v36  ;;  %v343_v49 = vsub.f32 %v994_v14, %v1022_v26 }
  0x5f   : > { %629 = vpow2.f32 %v319_v37  ;;  %v335_v51 = vmul.f32 1.442695, %v328_v40  ;;  %v344_v52 = vsub.f32 %v997_v15, %v1025_v27  ;;  %v345_v53 = vmul.f32 1.442695, %v341_v43 }
  0x60   : > { %631 = vpow2.f32 %v321_v38  ;;  %v357_v54 = vsub.f32 %v1001_v17, %v1016_v24  ;;  %vm255_vm1 = vcmp.eq.s32.totalorder %v1048_v44, 0  ;;  %v347_v55 = vmul.f32 1.442695, %v342_v46 }
  0x61   : > { %633 = vpow2.f32 %v323_v39  ;;  %v358_v56 = vsub.f32 %v1007_v21, %v1019_v25  ;;  %vm256_vm2 = vcmp.eq.s32.totalorder %v1052_v47, 0  ;;  %v349_v57 = vmul.f32 1.442695, %v343_v49 }
  0x62   : > { %635 = vpow2.f32 %v329_v42  ;;  %v359_v58 = vsub.f32 %v1010_v22, %v1022_v26  ;;  %vm257_vm3 = vcmp.eq.s32.totalorder %v1056_v50, 0  ;;  %v351_v59 = vmul.f32 1.442695, %v344_v52 }
  0x63   : > { %637 = vpow2.f32 %v331_v45  ;;  %v360_v60 = vsub.f32 %v1013_v23, %v1025_v27  ;;  %v258_v61 = vsel %vm254_vm0, %v956_v0, -inf  ;;  %v259_v62 = vsel %vm255_vm1, %v959_v1, -inf }
  0x64   : > { %639 = vpow2.f32 %v333_v48  ;;  %v361_v63 = vmul.f32 1.442695, %v357_v54  ;;  %v260_v8 = vsel %vm256_vm2, %v962_v2, -inf  ;;  %vm271_vm4 = vcmp.eq.s32.totalorder %v1044_v41, 1 }
  0x65   : > { %641 = vpow2.f32 %v335_v51  ;;  %v363_v10 = vmul.f32 1.442695, %v358_v56  ;;  %vm272_vm5 = vcmp.eq.s32.totalorder %v1048_v44, 1  ;;  %vm273_vm6 = vcmp.eq.s32.totalorder %v1052_v47, 1 }
  0x66   : > { %643 = vpow2.f32 %v345_v53  ;;  %v365_v12 = vmul.f32 1.442695, %v359_v58  ;;  %v261_v0 = vsel %vm257_vm3, %v965_v3, -inf  ;;  %vm274_vm7 = vcmp.eq.s32.totalorder %v1056_v50, 1 }
  0x67   : > { %645 = vpow2.f32 %v347_v55  ;;  %v367_v1 = vmul.f32 1.442695, %v360_v60  ;;  %v275_v18 = vsel %vm271_vm4, %v968_v4, %v258_v61  ;;  %vm288_vm8 = vcmp.eq.s32.totalorder %v1044_v41, 2 }
  0x68   : > { %v628_v11 = vpop.eup %627  ;;  %647 = vpow2.f32 %v349_v57  ;;  %v276_v20 = vsel %vm272_vm5, %v971_v5, %v259_v62  ;;  %v277_v28 = vsel %vm273_vm6, %v974_v6, %v260_v8  ;;  %vm289_vm9 = vcmp.eq.s32.totalorder %v1048_v44, 2 }
  0x69   : > { %v630_v16 = vpop.eup %629  ;;  %649 = vpow2.f32 %v351_v59  ;;  %v278_v3 = vsel %vm274_vm7, %v977_v7, %v261_v0  ;;  %vm290_vm10 = vcmp.eq.s32.totalorder %v1052_v47, 2  ;;  %vm291_vm11 = vcmp.eq.s32.totalorder %v1056_v50, 2 }
  0x6a   : > { %v632_v2 = vpop.eup %631  ;;  %651 = vpow2.f32 %v361_v63  ;;  %v292_v30 = vsel %vm288_vm8, %v982_v9, %v275_v18  ;;  %vm305_vm12 = vcmp.eq.s32.totalorder %v1044_v41, 3  ;;  %v293_v6 = vsel %vm289_vm9, %v991_v13, %v276_v20 }
  0x6b   : > { %v634_v19 = vpop.eup %633  ;;  %653 = vpow2.f32 %v363_v10  ;;  %vm306_vm13 = vcmp.eq.s32.totalorder %v1048_v44, 3  ;;  %v294_v7 = vsel %vm290_vm10, %v994_v14, %v277_v28  ;;  %vm307_vm14 = vcmp.eq.s32.totalorder %v1052_v47, 3 }
  0x6c   : > { %v636_v29 = vpop.eup %635  ;;  %655 = vpow2.f32 %v365_v12  ;;  %v295_v9 = vsel %vm291_vm11, %v997_v15, %v278_v3  ;;  %vm308_vm15 = vcmp.eq.s32.totalorder %v1056_v50, 3  ;;  %v309_v36 = vsel %vm305_vm12, %v1001_v17, %v292_v30 }
  0x6d   : > { %v638_v4 = vpop.eup %637  ;;  %v337_v31 = vadd.f32 %v636_v29, %v628_v11  ;;  %657 = vpow2.f32 %v367_v1  ;;  %v310_v38 = vsel %vm306_vm13, %v1007_v21, %v293_v6  ;;  %v311_v14 = vsel %vm307_vm14, %v1010_v22, %v294_v7 }
  0x6e   : > { %v640_v5 = vpop.eup %639  ;;  %v338_v32 = vadd.f32 %v638_v4, %v630_v16  ;;  %v312_v43 = vsel %vm308_vm15, %v1013_v23, %v295_v9  ;;  %v389_v45 = vsub.f32 %v309_v36, %v1016_v24  ;;  %v390_v47 = vsub.f32 %v310_v38, %v1019_v25 }
  0x6f   : > { %v642_v33 = vpop.eup %641  ;;  %v339_v34 = vadd.f32 %v640_v5, %v632_v2  ;;  %v391_v49 = vsub.f32 %v311_v14, %v1022_v26  ;;  %v392_v51 = vsub.f32 %v312_v43, %v1025_v27  ;;  %vm425_vm0 = vcmask 0  }
  0x70   : > { %v644_v35 = vpop.eup %643  ;;  %v340_v37 = vadd.f32 %v642_v33, %v634_v19  ;;  %v393_v53 = vmul.f32 1.442695, %v389_v45  ;;  %v395_v54 = vmul.f32 1.442695, %v390_v47 }
  0x71   : > { %v646_v13 = vpop.eup %645  ;;  %v353_v39 = vadd.f32 %v644_v35, %v337_v31  ;;  %v397_v24 = vmul.f32 1.442695, %v391_v49  ;;  %v399_v55 = vmul.f32 1.442695, %v392_v51 }
  0x72   : > { %v648_v40 = vpop.eup %647  ;;  %v354_v41 = vadd.f32 %v646_v13, %v338_v32 }
  0x73   : > { %v650_v42 = vpop.eup %649  ;;  %v355_v44 = vadd.f32 %v648_v40, %v339_v34 }
  0x74   : > { %v652_v15 = vpop.eup %651  ;;  %v356_v46 = vadd.f32 %v650_v42, %v340_v37 }
  0x75   : > { %v654_v17 = vpop.eup %653  ;;  %v369_v48 = vadd.f32 %v652_v15, %v353_v39 }
  0x76   : > { %v656_v21 = vpop.eup %655  ;;  %v370_v50 = vadd.f32 %v654_v17, %v354_v41 }
  0x77   : > { %v658_v22 = vpop.eup %657  ;;  %v371_v52 = vadd.f32 %v656_v21, %v355_v44  ;;  %659 = vrcp.f32 %v369_v48 }
  0x78   : > { %v372_v23 = vadd.f32 %v658_v22, %v356_v46  ;;  %661 = vrcp.f32 %v370_v50 }
  0x79   : > { %663 = vrcp.f32 %v371_v52 }
  0x7a   : > { %665 = vrcp.f32 %v372_v23 }
  0x7b   : > { %667 = vpow2.f32 %v393_v53 }
  0x7c   : > { %669 = vpow2.f32 %v395_v54 }
  0x7d   : > { %671 = vpow2.f32 %v397_v24 }
  0x7e   : > { %673 = vpow2.f32 %v399_v55 }
  0x81   : > { %v660_v25 = vpop.eup %659 }
  0x82   : > { %v662_v26 = vpop.eup %661  ;;  %v377_v56 = vmul.f32 %v660_v25, %v369_v48 }
  0x83   : > { %v664_v57 = vpop.eup %663  ;;  %v378_v27 = vmul.f32 %v662_v26, %v370_v50 }
  0x84   : > { %v666_v58 = vpop.eup %665  ;;  %v379_v59 = vmul.f32 %v664_v57, %v371_v52  ;;  %v381_v60 = vsub.f32 2.0, %v377_v56 }
  0x85   : > { %v668_v61 = vpop.eup %667  ;;  %v380_v62 = vmul.f32 %v666_v58, %v372_v23  ;;  %v382_v63 = vsub.f32 2.0, %v378_v27 }
  0x86   : > { %v670_v8 = vpop.eup %669  ;;  %v383_v10 = vsub.f32 2.0, %v379_v59  ;;  %v385_v11 = vmul.f32 %v660_v25, %v381_v60 }
  0x87   : > { %v672_v12 = vpop.eup %671  ;;  %v384_v16 = vsub.f32 2.0, %v380_v62  ;;  %v386_v0 = vmul.f32 %v662_v26, %v382_v63 }
  0x88   : > { %v674_v1 = vpop.eup %673  ;;  %v387_v2 = vmul.f32 %v664_v57, %v383_v10  ;;  %v401_v18 = vmul.f32 %v668_v61, %v385_v11 }
  0x89   : > { %v388_v19 = vmul.f32 %v666_v58, %v384_v16  ;;  %v402_v20 = vmul.f32 %v670_v8, %v386_v0 }
  0x8a   : > { %v403_v28 = vmul.f32 %v672_v12, %v387_v2 }
  0x8b   : > { %v404_v29 = vmul.f32 %v674_v1, %v388_v19  ;;  %v406_v3 = vadd.f32 %v402_v20, %v401_v18 }
  0x8d   : > { %v407_v4 = vadd.f32 %v406_v3, %v403_v28 }
  0x8f   : > { %v408_v30 = vadd.f32 %v407_v4, %v404_v29 }
  0x91   : > { %415 = vadd.xlane.f32.xlu0 %v408_v30 }
 0x11e   : > { %v416_v31 = vpop.xlane.xlu0 %415 }
 0x11f   : > { %v417_v5 = vrot.slane %v416_v31, 4 }
 0x121   : > { %v418_v6 = vadd.f32 %v417_v5, %v416_v31 }
 0x123   : > { %v419_v32 = vrot.slane %v418_v6, 2 }
 0x125   : > { %v420_v33 = vadd.f32 %v419_v32, %v418_v6 }
 0x127   : > { %v421_v7 = vrot.slane %v420_v33, 1 }
 0x129   : > { %v422_v34 = vadd.f32 %v421_v7, %v420_v33 }
 0x12b   : > { %563 = vpush %v422_v34 }
 0x15c   : > { %s564_s8 = spop %563 }
 0x15d   : > { %v424_v35 = vstv %s564_s8 }
 0x15e   : > { %426 = vst.msk [vmem:[%s239_s5] sm:$0x1] %vm425_vm0, %v424_v35 }
 0x15f PF: > { %s18_s14 = sadd.s32 1, %s789_s14   ;;  %s1143_s9 = smov %s773_s10 }
 0x160   : > { %p15_p9 = scmp.ge.s32.totalorder %s18_s14, 4   ;;  %s1144_s10 = smov %s777_s11 }
 0x161   : > { %s1145_s11 = smov %s859_s21  ;;  %s1146_s12 = smov %s785_s13 }
 0x162   : > { %s1147_s13 = smov %s1149_s16  ;;  %17 = sbr.rel (!%p15_p9) target bundleno = 6 (0x6), region = 92 }
 0x169   :  { %450 = vsyncpa [#allocation4], 1 }
 0x16a   :  { %452 = vsyncpa [#allocation4 + $0x1], 1 }
 0x16b   :  { %453 = vsyncpa [#allocation6], 1 }
 0x16c   :  { %455 = vsyncpa [#allocation6 + $0x1], 1 }

</bundles_post_ra>
